<compile_context>
chip_gen: v5e
topology: v5e:2x2
jax: 0.10.0
libtpu: 0.0.40
codegen_flags: <defaults>
</compile_context>

<pallas_src>
import math
import functools

import jax
import jax.numpy as jnp
from jax.experimental import pallas as pl
from jax.experimental.pallas import tpu as pltpu


# ---------------------------------------------------------------------------
# Buffer setup (matches PositionalEncoding.__init__, squeezed to 2-D)
# ---------------------------------------------------------------------------
def make_positional_encoding(d_model: int, max_len: int = 5000,
                             dtype=jnp.float32) -> jnp.ndarray:
    """Returns pe with shape (max_len, d_model).

    Values are identical to the PyTorch buffer (max_len, 1, d_model); the size-1
    batch dim only existed for broadcasting and is re-added inside the kernel.
    """
    position = jnp.arange(max_len, dtype=jnp.float32)[:, None]              # (max_len, 1)
    div_term = jnp.exp(
        jnp.arange(0, d_model, 2, dtype=jnp.float32) * (-math.log(10000.0) / d_model)
    )                                                                       # (d_model//2,)
    angles = position * div_term                                            # (max_len, d_model//2)
    pe = jnp.zeros((max_len, d_model), dtype=jnp.float32)
    pe = pe.at[:, 0::2].set(jnp.sin(angles))
    pe = pe.at[:, 1::2].set(jnp.cos(angles))
    return pe.astype(dtype)


# ---------------------------------------------------------------------------
# Pallas kernels  (blocks:  x/out -> (ts, B*D),  pe -> (ts, D),  bits -> (ts, B*D))
# ---------------------------------------------------------------------------
def _pe_add_kernel(x_ref, pe_ref, o_ref, *, batch):
    # Eval-mode forward: x + pe[:S]   (dropout is identity in eval).
    pe_b = jnp.tile(pe_ref[...], (1, batch)) if batch > 1 else pe_ref[...]
    o_ref[...] = (x_ref[...] + pe_b).astype(o_ref.dtype)


def _pe_add_dropout_kernel(x_ref, pe_ref, bits_ref, o_ref, *,
                           batch, keep_prob, keep_threshold):
    # Training-mode forward: inverted dropout on (x + pe[:S]).
    # keep  <=>  uniform uint32 bits < keep_prob * 2^32  (direct integer compare).
    pe_b = jnp.tile(pe_ref[...], (1, batch)) if batch > 1 else pe_ref[...]
    y = (x_ref[...] + pe_b).astype(o_ref.dtype)
    keep = bits_ref[...] < jnp.uint32(keep_threshold)
    o_ref[...] = jnp.where(keep, y * (1.0 / keep_prob), jnp.zeros_like(y))


# ---------------------------------------------------------------------------
# Wrapper
# ---------------------------------------------------------------------------
def _row_tile(n_rows: int, bytes_per_row: int,
              per_tile_budget: int = 2 * 1024 * 1024) -> int:
    """Largest seq-row tile (multiple of 8 sublanes) that keeps each data tile
    <= ~2 MiB, so the double-buffered (x, bits, out, pe) working set stays well
    inside the 32 MiB scoped-VMEM default on every TPU generation (v7x incl.)."""
    ts = max(1, min(n_rows, per_tile_budget // max(bytes_per_row, 1)))
    ts = max(8, (ts // 8) * 8)
    return ts


def _compiler_params(n_grid_axes: int):
    # pltpu.CompilerParams on current JAX; TPUCompilerParams on older releases.
    try:
        cls = getattr(pltpu, "CompilerParams", None) or pltpu.TPUCompilerParams
        return cls(dimension_semantics=("parallel",) * n_grid_axes,
                   vmem_limit_bytes=32 * 1024 * 1024)
    except Exception:
        return None


def positional_encoding_forward(x, pe, *, p: float = 0.1,
                                training: bool = False, rng_key=None):
    """y = dropout(x + pe[:S]);  x: (S, B, D), pe: (max_len, D) or (max_len, 1, D)."""
    S, B, D = x.shape
    if pe.ndim == 3:                    # accept the PyTorch-shaped buffer too
        pe = pe[:, 0, :]
    pe = pe.astype(x.dtype)             # single dtype end-to-end (bandwidth)

    x2 = x.reshape(S, B * D)            # free view: batch collapsed into lanes

    ts = _row_tile(S, B * D * x.dtype.itemsize)
    grid = (pl.cdiv(S, ts),)
    x_spec = pl.BlockSpec((ts, B * D), lambda i: (i, 0))
    pe_spec = pl.BlockSpec((ts, D), lambda i: (i, 0))   # rows of the FULL pe buffer
    cp = _compiler_params(len(grid))

    if (not training) or p == 0.0:
        y2 = pl.pallas_call(
            functools.partial(_pe_add_kernel, batch=B),
            out_shape=jax.ShapeDtypeStruct((S, B * D), x.dtype),
            grid=grid,
            in_specs=[x_spec, pe_spec],
            out_specs=x_spec,
            compiler_params=cp,
        )(x2, pe)
        return y2.reshape(S, B, D)

    keep_prob = 1.0 - float(p)
    keep_threshold = min(int(round(keep_prob * (1 << 32))), (1 << 32) - 1)
    if rng_key is None:
        rng_key = jax.random.PRNGKey(0)
    # Uniform uint32 bits, one per output element (per-call key => fresh mask
    # every training step; no per-tile seed correlation since bits cover the
    # whole array).  RNG stream differs from torch.nn.Dropout; semantics match.
    bits = jax.random.bits(rng_key, (S, B * D), dtype=jnp.uint32)

    y2 = pl.pallas_call(
        functools.partial(_pe_add_dropout_kernel, batch=B,
                          keep_prob=keep_prob, keep_threshold=keep_threshold),
        out_shape=jax.ShapeDtypeStruct((S, B * D), x.dtype),
        grid=grid,
        in_specs=[x_spec, pe_spec, x_spec],
        out_specs=x_spec,
        compiler_params=cp,
    )(x2, pe, bits)
    return y2.reshape(S, B, D)


# ---------------------------------------------------------------------------
# Main
# ---------------------------------------------------------------------------
if __name__ == "__main__":
    S, B, D = 8, 2, 32          # seq_len, batch, d_model
    MAX_LEN = 64

    key = jax.random.PRNGKey(0)
    k_x, k_drop = jax.random.split(key)
    x = jax.random.normal(k_x, (S, B, D), dtype=jnp.float32)
    pe = make_positional_encoding(D, max_len=MAX_LEN)

    # Eval-mode forward (dropout is identity) -- check against pure-JAX reference.
    y_eval = jax.block_until_ready(positional_encoding_forward(x, pe, training=False))
    ref = x + pe[:S][:, None, :]
    assert y_eval.shape == x.shape and y_eval.dtype == x.dtype
    assert jnp.allclose(y_eval, ref, atol=1e-6), "eval-mode mismatch"

    # Training-mode forward (exercises the dropout kernel).
    p = 0.1
    kp = 1.0 - p
    y_train = jax.block_until_ready(
        positional_encoding_forward(x, pe, p=p, training=True, rng_key=k_drop)
    )
    assert y_train.shape == x.shape
    # Every surviving element must equal ref / keep_prob; dropped elements are 0.
    survived = y_train != 0.0
    recon = jnp.where(survived, y_train * kp, ref)
    assert jnp.allclose(recon, ref, atol=1e-5), "train-mode mismatch"

    print("KERNEL_OK")
</pallas_src>

<mosaic_0001>
module attributes {stable_mosaic.version = 11 : i64} {
  func.func @_pe_add_kernel(%arg0: i32, %arg1: memref<8x64xf32, #tpu.memory_space<vmem>>, %arg2: memref<8x32xf32, #tpu.memory_space<vmem>>, %arg3: memref<8x64xf32, #tpu.memory_space<vmem>>) attributes {dimension_semantics = [#tpu.dimension_semantics<parallel>], iteration_bounds = array<i64: 1>, scalar_prefetch = 0 : i64, scratch_operands = 0 : i64, tpu.core_type = #tpu.core_type<tc>, window_params = [{transform_indices = @transform_0, window_bounds = array<i64: 8, 64>}, {transform_indices = @transform_1, window_bounds = array<i64: 8, 32>}, {transform_indices = @transform_2, window_bounds = array<i64: 8, 64>}]} {
    %c0 = arith.constant 0 : index
    %c0_0 = arith.constant 0 : index
    %0 = vector.load %arg2[%c0, %c0_0] : memref<8x32xf32, #tpu.memory_space<vmem>>, vector<8x32xf32>
    %1 = tpu.concatenate %0, %0 in 1 : vector<8x32xf32>, vector<8x32xf32> -> vector<8x64xf32>
    %c0_1 = arith.constant 0 : index
    %c0_2 = arith.constant 0 : index
    %2 = vector.load %arg1[%c0_1, %c0_2] : memref<8x64xf32, #tpu.memory_space<vmem>>, vector<8x64xf32>
    %3 = arith.addf %2, %1 : vector<8x64xf32>
    %c0_3 = arith.constant 0 : index
    %c0_4 = arith.constant 0 : index
    %4 = vector.load %arg3[%c0_3, %c0_4] : memref<8x64xf32, #tpu.memory_space<vmem>>, vector<8x64xf32>
    tpu.vector_store %arg3[%c0_3, %c0_4], %3 {strides = array<i32>} : memref<8x64xf32, #tpu.memory_space<vmem>>, vector<8x64xf32>,
    return
  }
  func.func @transform_0(%arg0: i32) -> (i32, i32) {
    %c0_i32 = arith.constant 0 : i32
    %c0_i32_0 = arith.constant 0 : i32
    return %arg0, %c0_i32 : i32, i32
  }
  func.func @transform_1(%arg0: i32) -> (i32, i32) {
    %c0_i32 = arith.constant 0 : i32
    %c0_i32_0 = arith.constant 0 : i32
    return %arg0, %c0_i32 : i32, i32
  }
  func.func @transform_2(%arg0: i32) -> (i32, i32) {
    %c0_i32 = arith.constant 0 : i32
    %c0_i32_0 = arith.constant 0 : i32
    return %arg0, %c0_i32 : i32, i32
  }
}

</mosaic_0001>

<bundles_post_ra>
// kernel: tpu_custom_call.1
= control target key start
LH: loop header
LB: loop body
LE: loop exit
PB: predicated region body
PF: predicated region fallthrough
CT: control target
= control target key end

     0   :  { %s93_s0 = inlined_call_operand.vmem [shape: f32[8,64], index: 0, kind: input, shape index: {}]   ;;  %s94_s1 = inlined_call_operand.vmem [shape: f32[64,32], index: 1, kind: input, shape index: {}]   ;;  %s95_s2 = inlined_call_operand.hbm [shape: f32[8,64], index: 2, kind: output, shape index: {}]  }
   0x1   :  { %v12_v0 = vld [vmem:[%s94_s1] sm:$0xff] }
   0x2   :  { %7 = vsyncpa [#allocation3], 0  ;;  %s67_s11 = smov 32   ;;  %vm17_vm0 = vcmask 261120   ;;  %v19_v1 = vld [vmem:[%s93_s0] sm:$0xff]  ;;  %s68_s14 = smov [#allocation2]  }
   0x3   :  { %14 = vrot.lane.b32.xlu0 %v12_v0, %s67_s11  ;;  %s28_s15 = sshll.u32 %s68_s14, 4  ;;  %s30_s18 = sshll.u32 %s95_s2, 4  ;;  %vm21_vm1 = vcmask 523264   ;;  %s29_s15 = int_to_ptr.vmem [resolvable:$true] %s28_s15  ;;  %s31_s18 = int_to_ptr.hbm [resolvable:$true] %s30_s18 }
  0x75   :  { %v15_v2 = vpop.permute.xlu0 %14 }
  0x76   :  { %v18_v3 = vsel %vm17_vm0, %v12_v0, %v15_v2 }
  0x77   :  { %v20_v4 = vadd.f32 %v19_v1, %v18_v3 }
  0x79   :  { %22 = vst.msk [vmem:[#allocation2] sm:$0xff] %vm21_vm1, %v20_v4 }
  0x7a   :  { %33 = dma.vmem_to_hbm [thread:$0]  %s29_s15, 128, %s31_s18, [#allocation3]  }
  0x7b   :  { %65 = dma.done.wait [#allocation3], 128  }
  0x7c   :  { %66 = vsyncadd [#allocation3], 4294967168 }
  0x7d   :  { %38 = vsyncpa [#allocation3], 1 }

</bundles_post_ra>
